<compile_context>
chip_gen: v5e
topology: v5e:2x2
jax: 0.10.0
libtpu: 0.0.40
codegen_flags: <defaults>
</compile_context>

<pallas_src>
import jax
import jax.numpy as jnp
from jax import lax
from jax.experimental import pallas as pl
from jax.experimental.pallas import tpu as pltpu

EPS = 1e-5


def _v2i_kernel(wf_ref, wr_ref, g2_ref, b2_ref, g3_ref, b3_ref,
                x_ref, y_ref, z_ref):
    # SMEM params: wf/wr (C, T); g2/b2/g3/b3 (C,)
    # VMEM blocks:  x_ref (B, T, N), y_ref (B, N), z_ref (B, T, N)
    c = pl.program_id(0)
    B, T, N = x_ref.shape

    # ---- forward 1x1 Conv2d(T -> 1): scalar-weighted accumulate over T ----------
    y = x_ref[:, 0, :] * wf_ref[c, 0]
    for t in range(1, T):
        y = y + x_ref[:, t, :] * wf_ref[c, t]                      # (B, N)

    # ---- BatchNorm2d (training-mode stats over B*H*W), single pass, + ReLU ------
    inv_n2 = 1.0 / (B * N)
    mean2 = jnp.sum(y) * inv_n2
    ex2 = jnp.sum(y * y) * inv_n2
    var2 = ex2 - mean2 * mean2
    scale2 = lax.rsqrt(var2 + EPS) * g2_ref[c]
    bias2 = b2_ref[c] - mean2 * scale2
    y_act = jnp.maximum(y * scale2 + bias2, 0.0)                   # (B, N)
    y_ref[...] = y_act                                             # compressed plane

    # ---- BatchNorm3d via exact rank-1 structure: z[b,t,n] = y_act[b,n] * wr[t] ---
    m_y = jnp.sum(y_act) * inv_n2                                  # E[y_act]
    m_y2 = jnp.sum(y_act * y_act) * inv_n2                         # E[y_act^2]
    sw = wr_ref[c, 0]
    sw2 = wr_ref[c, 0] * wr_ref[c, 0]
    for t in range(1, T):
        w = wr_ref[c, t]
        sw = sw + w
        sw2 = sw2 + w * w
    mean3 = m_y * (sw / T)
    var3 = m_y2 * (sw2 / T) - mean3 * mean3
    scale3 = lax.rsqrt(var3 + EPS) * g3_ref[c]
    bias3 = b3_ref[c] - mean3 * scale3

    # fused reverse 1x1 Conv2d(1 -> T) + BN3 + ReLU: one FMA + max per element ----
    for t in range(T):
        z_ref[:, t, :] = jnp.maximum(y_act * (wr_ref[c, t] * scale3) + bias3, 0.0)


def video2image_pallas(x, w_fwd, w_rev, gamma2, beta2, gamma3, beta3):
    """x: (B, 3, T, H, W) f32. Returns (compressed (B,3,H,W), reversed (B,3,T,H,W))."""
    B, C, T, H, W = x.shape
    assert C == 3
    N = H * W

    # Free reshape only — no HBM transpose of the big tensors.
    x_k = x.reshape(B, C, T, N)

    # Double-buffered VMEM block budget: x block + z block + y block.
    dbuf_bytes = 2 * 4 * (B * T * N + B * T * N + B * N)
    vmem_limit = int(min(max(2 * dbuf_bytes, 16 * 1024 * 1024), 64 * 1024 * 1024))

    grid_spec = pltpu.PrefetchScalarGridSpec(
        num_scalar_prefetch=0,
        grid=(C,),
        in_specs=[
            pl.BlockSpec(memory_space=pltpu.MemorySpace.SMEM),   # w_fwd  (C, T)
            pl.BlockSpec(memory_space=pltpu.MemorySpace.SMEM),   # w_rev  (C, T)
            pl.BlockSpec(memory_space=pltpu.MemorySpace.SMEM),   # gamma2 (C,)
            pl.BlockSpec(memory_space=pltpu.MemorySpace.SMEM),   # beta2  (C,)
            pl.BlockSpec(memory_space=pltpu.MemorySpace.SMEM),   # gamma3 (C,)
            pl.BlockSpec(memory_space=pltpu.MemorySpace.SMEM),   # beta3  (C,)
            # x in native (B, C, T, N); channel selected via index_map, C squeezed.
            pl.BlockSpec((B, None, T, N), lambda c: (0, c, 0, 0)),
        ],
        out_specs=[
            # compressed: channel-major (C, B, N) -> lane-dense stores; tiny output.
            pl.BlockSpec((None, B, N), lambda c: (c, 0, 0)),
            # reversed stays in native (B, C, T, N): no post-kernel transpose.
            pl.BlockSpec((B, None, T, N), lambda c: (0, c, 0, 0)),
        ],
    )

    y_k, z_k = pl.pallas_call(
        _v2i_kernel,
        out_shape=(
            jax.ShapeDtypeStruct((C, B, N), jnp.float32),
            jax.ShapeDtypeStruct((B, C, T, N), jnp.float32),
        ),
        grid_spec=grid_spec,
        compiler_params=pltpu.CompilerParams(
            dimension_semantics=("parallel",),
            vmem_limit_bytes=vmem_limit,
        ),
    )(w_fwd, w_rev, gamma2, beta2, gamma3, beta3, x_k)

    compressed = jnp.transpose(y_k.reshape(C, B, H, W), (1, 0, 2, 3))   # (B,3,H,W) tiny
    reversed_ = z_k.reshape(B, C, T, H, W)                              # free reshape
    return compressed, reversed_


def video2image_ref(x, w_fwd, w_rev, gamma2, beta2, gamma3, beta3):
    """Pure-JAX reference mirroring the PyTorch forward (training-mode BN)."""
    B, C, T, H, W = x.shape
    y = jnp.einsum('bcthw,ct->bchw', x, w_fwd)                      # 1x1 convs (T->1)
    m2 = y.mean(axis=(0, 2, 3), keepdims=True)
    v2 = ((y - m2) ** 2).mean(axis=(0, 2, 3), keepdims=True)
    y = (y - m2) / jnp.sqrt(v2 + EPS) * gamma2.reshape(1, C, 1, 1) + beta2.reshape(1, C, 1, 1)
    y = jnp.maximum(y, 0.0)
    z = y[:, :, None, :, :] * w_rev.reshape(1, C, T, 1, 1)          # reverse 1x1 convs
    m3 = z.mean(axis=(0, 2, 3, 4), keepdims=True)
    v3 = ((z - m3) ** 2).mean(axis=(0, 2, 3, 4), keepdims=True)
    z = (z - m3) / jnp.sqrt(v3 + EPS) * gamma3.reshape(1, C, 1, 1, 1) + beta3.reshape(1, C, 1, 1, 1)
    z = jnp.maximum(z, 0.0)
    return y, z


if __name__ == "__main__":
    # Small shapes consistent with the module: T (= inp_channel) = 8, 3 color planes.
    B, C, T, H, W = 2, 3, 8, 16, 16

    key = jax.random.PRNGKey(0)
    k_x, k_wf, k_wr, k_g2, k_b2, k_g3, k_b3 = jax.random.split(key, 7)

    x = jax.random.normal(k_x, (B, C, T, H, W), dtype=jnp.float32)

    # Synthetic parameter init; shapes follow the nn.Module:
    #   channel{1,2,3}:        Conv2d(T, 1, 1x1, bias=False) weight -> stored as (3, T)
    #   channel{1,2,3}_reverse: Conv2d(1, T, 1x1, bias=False) weight -> stored as (3, T)
    w_fwd = 0.1 * jax.random.normal(k_wf, (C, T), dtype=jnp.float32)
    w_rev = 0.1 * jax.random.normal(k_wr, (C, T), dtype=jnp.float32)
    gamma2 = 1.0 + 0.1 * jax.random.normal(k_g2, (C,), dtype=jnp.float32)
    beta2 = 0.1 * jax.random.normal(k_b2, (C,), dtype=jnp.float32)
    gamma3 = 1.0 + 0.1 * jax.random.normal(k_g3, (C,), dtype=jnp.float32)
    beta3 = 0.1 * jax.random.normal(k_b3, (C,), dtype=jnp.float32)

    comp, rev = video2image_pallas(x, w_fwd, w_rev, gamma2, beta2, gamma3, beta3)
    comp = jax.block_until_ready(comp)
    rev = jax.block_until_ready(rev)

    comp_ref, rev_ref = video2image_ref(x, w_fwd, w_rev, gamma2, beta2, gamma3, beta3)

    assert comp.shape == (B, C, H, W) and rev.shape == (B, C, T, H, W)
    assert jnp.allclose(comp, comp_ref, atol=2e-4, rtol=2e-4), "compressed mismatch"
    assert jnp.allclose(rev, rev_ref, atol=2e-4, rtol=2e-4), "reversed mismatch"

    print("KERNEL_OK")
</pallas_src>

<mosaic_0001>
module attributes {stable_mosaic.version = 11 : i64} {
  func.func @_v2i_kernel(%arg0: i32, %arg1: memref<3x8xf32, #tpu.memory_space<smem>>, %arg2: memref<3x8xf32, #tpu.memory_space<smem>>, %arg3: memref<3xf32, #tpu.memory_space<smem>>, %arg4: memref<3xf32, #tpu.memory_space<smem>>, %arg5: memref<3xf32, #tpu.memory_space<smem>>, %arg6: memref<3xf32, #tpu.memory_space<smem>>, %arg7: memref<2x1x8x256xf32, #tpu.memory_space<vmem>>, %arg8: memref<1x2x256xf32, #tpu.memory_space<vmem>>, %arg9: memref<2x1x8x256xf32, #tpu.memory_space<vmem>>) attributes {dimension_semantics = [#tpu.dimension_semantics<parallel>], iteration_bounds = array<i64: 3>, scalar_prefetch = 0 : i64, scratch_operands = 0 : i64, tpu.core_type = #tpu.core_type<tc>, window_params = [{transform_indices = @transform_0, window_bounds = array<i64: 3, 8>}, {transform_indices = @transform_1, window_bounds = array<i64: 3, 8>}, {transform_indices = @transform_2, window_bounds = array<i64: 3>}, {transform_indices = @transform_3, window_bounds = array<i64: 3>}, {transform_indices = @transform_4, window_bounds = array<i64: 3>}, {transform_indices = @transform_5, window_bounds = array<i64: 3>}, {transform_indices = @transform_6, window_bounds = array<i64: 2, 1, 8, 256>}, {transform_indices = @transform_7, window_bounds = array<i64: 1, 2, 256>}, {transform_indices = @transform_8, window_bounds = array<i64: 2, 1, 8, 256>}]} {
    %c0 = arith.constant 0 : index
    %c0_0 = arith.constant 0 : index
    %c0_1 = arith.constant 0 : index
    %c0_2 = arith.constant 0 : index
    %0 = vector.load %arg7[%c0, %c0_0, %c0_1, %c0_2] : memref<2x1x8x256xf32, #tpu.memory_space<vmem>>, vector<2x1x1x256xf32>
    %1 = vector.shape_cast %0 : vector<2x1x1x256xf32> to vector<2x256xf32>
    %2 = arith.index_cast %arg0 : i32 to index
    %c0_3 = arith.constant 0 : index
    %3 = memref.load %arg1[%2, %c0_3] : memref<3x8xf32, #tpu.memory_space<smem>>
    %4 = vector.broadcast %3 : f32 to vector<2x256xf32>
    %5 = arith.mulf %1, %4 : vector<2x256xf32>
    %c0_4 = arith.constant 0 : index
    %c0_5 = arith.constant 0 : index
    %c1 = arith.constant 1 : index
    %c0_6 = arith.constant 0 : index
    %6 = vector.load %arg7[%c0_4, %c0_5, %c1, %c0_6] : memref<2x1x8x256xf32, #tpu.memory_space<vmem>>, vector<2x1x1x256xf32>
    %7 = vector.shape_cast %6 : vector<2x1x1x256xf32> to vector<2x256xf32>
    %8 = arith.index_cast %arg0 : i32 to index
    %c1_7 = arith.constant 1 : index
    %9 = memref.load %arg1[%8, %c1_7] : memref<3x8xf32, #tpu.memory_space<smem>>
    %10 = vector.broadcast %9 : f32 to vector<2x256xf32>
    %11 = arith.mulf %7, %10 : vector<2x256xf32>
    %12 = arith.addf %5, %11 : vector<2x256xf32>
    %c0_8 = arith.constant 0 : index
    %c0_9 = arith.constant 0 : index
    %c2 = arith.constant 2 : index
    %c0_10 = arith.constant 0 : index
    %13 = vector.load %arg7[%c0_8, %c0_9, %c2, %c0_10] : memref<2x1x8x256xf32, #tpu.memory_space<vmem>>, vector<2x1x1x256xf32>
    %14 = vector.shape_cast %13 : vector<2x1x1x256xf32> to vector<2x256xf32>
    %15 = arith.index_cast %arg0 : i32 to index
    %c2_11 = arith.constant 2 : index
    %16 = memref.load %arg1[%15, %c2_11] : memref<3x8xf32, #tpu.memory_space<smem>>
    %17 = vector.broadcast %16 : f32 to vector<2x256xf32>
    %18 = arith.mulf %14, %17 : vector<2x256xf32>
    %19 = arith.addf %12, %18 : vector<2x256xf32>
    %c0_12 = arith.constant 0 : index
    %c0_13 = arith.constant 0 : index
    %c3 = arith.constant 3 : index
    %c0_14 = arith.constant 0 : index
    %20 = vector.load %arg7[%c0_12, %c0_13, %c3, %c0_14] : memref<2x1x8x256xf32, #tpu.memory_space<vmem>>, vector<2x1x1x256xf32>
    %21 = vector.shape_cast %20 : vector<2x1x1x256xf32> to vector<2x256xf32>
    %22 = arith.index_cast %arg0 : i32 to index
    %c3_15 = arith.constant 3 : index
    %23 = memref.load %arg1[%22, %c3_15] : memref<3x8xf32, #tpu.memory_space<smem>>
    %24 = vector.broadcast %23 : f32 to vector<2x256xf32>
    %25 = arith.mulf %21, %24 : vector<2x256xf32>
    %26 = arith.addf %19, %25 : vector<2x256xf32>
    %c0_16 = arith.constant 0 : index
    %c0_17 = arith.constant 0 : index
    %c4 = arith.constant 4 : index
    %c0_18 = arith.constant 0 : index
    %27 = vector.load %arg7[%c0_16, %c0_17, %c4, %c0_18] : memref<2x1x8x256xf32, #tpu.memory_space<vmem>>, vector<2x1x1x256xf32>
    %28 = vector.shape_cast %27 : vector<2x1x1x256xf32> to vector<2x256xf32>
    %29 = arith.index_cast %arg0 : i32 to index
    %c4_19 = arith.constant 4 : index
    %30 = memref.load %arg1[%29, %c4_19] : memref<3x8xf32, #tpu.memory_space<smem>>
    %31 = vector.broadcast %30 : f32 to vector<2x256xf32>
    %32 = arith.mulf %28, %31 : vector<2x256xf32>
    %33 = arith.addf %26, %32 : vector<2x256xf32>
    %c0_20 = arith.constant 0 : index
    %c0_21 = arith.constant 0 : index
    %c5 = arith.constant 5 : index
    %c0_22 = arith.constant 0 : index
    %34 = vector.load %arg7[%c0_20, %c0_21, %c5, %c0_22] : memref<2x1x8x256xf32, #tpu.memory_space<vmem>>, vector<2x1x1x256xf32>
    %35 = vector.shape_cast %34 : vector<2x1x1x256xf32> to vector<2x256xf32>
    %36 = arith.index_cast %arg0 : i32 to index
    %c5_23 = arith.constant 5 : index
    %37 = memref.load %arg1[%36, %c5_23] : memref<3x8xf32, #tpu.memory_space<smem>>
    %38 = vector.broadcast %37 : f32 to vector<2x256xf32>
    %39 = arith.mulf %35, %38 : vector<2x256xf32>
    %40 = arith.addf %33, %39 : vector<2x256xf32>
    %c0_24 = arith.constant 0 : index
    %c0_25 = arith.constant 0 : index
    %c6 = arith.constant 6 : index
    %c0_26 = arith.constant 0 : index
    %41 = vector.load %arg7[%c0_24, %c0_25, %c6, %c0_26] : memref<2x1x8x256xf32, #tpu.memory_space<vmem>>, vector<2x1x1x256xf32>
    %42 = vector.shape_cast %41 : vector<2x1x1x256xf32> to vector<2x256xf32>
    %43 = arith.index_cast %arg0 : i32 to index
    %c6_27 = arith.constant 6 : index
    %44 = memref.load %arg1[%43, %c6_27] : memref<3x8xf32, #tpu.memory_space<smem>>
    %45 = vector.broadcast %44 : f32 to vector<2x256xf32>
    %46 = arith.mulf %42, %45 : vector<2x256xf32>
    %47 = arith.addf %40, %46 : vector<2x256xf32>
    %c0_28 = arith.constant 0 : index
    %c0_29 = arith.constant 0 : index
    %c7 = arith.constant 7 : index
    %c0_30 = arith.constant 0 : index
    %48 = vector.load %arg7[%c0_28, %c0_29, %c7, %c0_30] : memref<2x1x8x256xf32, #tpu.memory_space<vmem>>, vector<2x1x1x256xf32>
    %49 = vector.shape_cast %48 : vector<2x1x1x256xf32> to vector<2x256xf32>
    %50 = arith.index_cast %arg0 : i32 to index
    %c7_31 = arith.constant 7 : index
    %51 = memref.load %arg1[%50, %c7_31] : memref<3x8xf32, #tpu.memory_space<smem>>
    %52 = vector.broadcast %51 : f32 to vector<2x256xf32>
    %53 = arith.mulf %49, %52 : vector<2x256xf32>
    %54 = arith.addf %47, %53 : vector<2x256xf32>
    %55 = vector.shape_cast %54 : vector<2x256xf32> to vector<1x2x256xf32>
    %cst = arith.constant dense<0.000000e+00> : vector<1xf32>
    %56 = vector.multi_reduction <add>, %55, %cst [1, 2] : vector<1x2x256xf32> to vector<1xf32>
    %57 = vector.shape_cast %56 : vector<1xf32> to vector<1x1x1xf32>
    %58 = vector.extract %57[0, 0, 0] : f32 from vector<1x1x1xf32>
    %cst_32 = arith.constant 0.001953125 : f32
    %59 = arith.mulf %58, %cst_32 : f32
    %60 = arith.mulf %54, %54 : vector<2x256xf32>
    %61 = vector.shape_cast %60 : vector<2x256xf32> to vector<1x2x256xf32>
    %cst_33 = arith.constant dense<0.000000e+00> : vector<1xf32>
    %62 = vector.multi_reduction <add>, %61, %cst_33 [1, 2] : vector<1x2x256xf32> to vector<1xf32>
    %63 = vector.shape_cast %62 : vector<1xf32> to vector<1x1x1xf32>
    %64 = vector.extract %63[0, 0, 0] : f32 from vector<1x1x1xf32>
    %cst_34 = arith.constant 0.001953125 : f32
    %65 = arith.mulf %64, %cst_34 : f32
    %66 = arith.mulf %59, %59 : f32
    %67 = arith.subf %65, %66 : f32
    %cst_35 = arith.constant 9.99999974E-6 : f32
    %68 = arith.addf %67, %cst_35 : f32
    %69 = math.rsqrt %68 : f32
    %70 = arith.index_cast %arg0 : i32 to index
    %71 = memref.load %arg3[%70] : memref<3xf32, #tpu.memory_space<smem>>
    %72 = arith.mulf %69, %71 : f32
    %73 = arith.index_cast %arg0 : i32 to index
    %74 = memref.load %arg4[%73] : memref<3xf32, #tpu.memory_space<smem>>
    %75 = arith.mulf %59, %72 : f32
    %76 = arith.subf %74, %75 : f32
    %77 = vector.broadcast %72 : f32 to vector<2x256xf32>
    %78 = arith.mulf %54, %77 : vector<2x256xf32>
    %79 = vector.broadcast %76 : f32 to vector<2x256xf32>
    %80 = arith.addf %78, %79 : vector<2x256xf32>
    %cst_36 = arith.constant 0.000000e+00 : f32
    %81 = vector.broadcast %cst_36 : f32 to vector<2x256xf32>
    %82 = arith.maximumf %80, %81 : vector<2x256xf32>
    %c0_37 = arith.constant 0 : index
    %c0_38 = arith.constant 0 : index
    %c0_39 = arith.constant 0 : index
    %83 = vector.load %arg8[%c0_37, %c0_38, %c0_39] : memref<1x2x256xf32, #tpu.memory_space<vmem>>, vector<1x2x256xf32>
    %84 = vector.shape_cast %83 : vector<1x2x256xf32> to vector<2x256xf32>
    %85 = vector.shape_cast %82 : vector<2x256xf32> to vector<1x2x256xf32>
    tpu.vector_store %arg8[%c0_37, %c0_38, %c0_39], %85 {strides = array<i32>} : memref<1x2x256xf32, #tpu.memory_space<vmem>>, vector<1x2x256xf32>,
    %86 = vector.shape_cast %82 : vector<2x256xf32> to vector<1x2x256xf32>
    %cst_40 = arith.constant dense<0.000000e+00> : vector<1xf32>
    %87 = vector.multi_reduction <add>, %86, %cst_40 [1, 2] : vector<1x2x256xf32> to vector<1xf32>
    %88 = vector.shape_cast %87 : vector<1xf32> to vector<1x1x1xf32>
    %89 = vector.extract %88[0, 0, 0] : f32 from vector<1x1x1xf32>
    %cst_41 = arith.constant 0.001953125 : f32
    %90 = arith.mulf %89, %cst_41 : f32
    %91 = arith.mulf %82, %82 : vector<2x256xf32>
    %92 = vector.shape_cast %91 : vector<2x256xf32> to vector<1x2x256xf32>
    %cst_42 = arith.constant dense<0.000000e+00> : vector<1xf32>
    %93 = vector.multi_reduction <add>, %92, %cst_42 [1, 2] : vector<1x2x256xf32> to vector<1xf32>
    %94 = vector.shape_cast %93 : vector<1xf32> to vector<1x1x1xf32>
    %95 = vector.extract %94[0, 0, 0] : f32 from vector<1x1x1xf32>
    %cst_43 = arith.constant 0.001953125 : f32
    %96 = arith.mulf %95, %cst_43 : f32
    %97 = arith.index_cast %arg0 : i32 to index
    %c0_44 = arith.constant 0 : index
    %98 = memref.load %arg2[%97, %c0_44] : memref<3x8xf32, #tpu.memory_space<smem>>
    %99 = arith.index_cast %arg0 : i32 to index
    %c0_45 = arith.constant 0 : index
    %100 = memref.load %arg2[%99, %c0_45] : memref<3x8xf32, #tpu.memory_space<smem>>
    %101 = arith.index_cast %arg0 : i32 to index
    %c0_46 = arith.constant 0 : index
    %102 = memref.load %arg2[%101, %c0_46] : memref<3x8xf32, #tpu.memory_space<smem>>
    %103 = arith.mulf %100, %102 : f32
    %104 = arith.index_cast %arg0 : i32 to index
    %c1_47 = arith.constant 1 : index
    %105 = memref.load %arg2[%104, %c1_47] : memref<3x8xf32, #tpu.memory_space<smem>>
    %106 = arith.addf %98, %105 : f32
    %107 = arith.mulf %105, %105 : f32
    %108 = arith.addf %103, %107 : f32
    %109 = arith.index_cast %arg0 : i32 to index
    %c2_48 = arith.constant 2 : index
    %110 = memref.load %arg2[%109, %c2_48] : memref<3x8xf32, #tpu.memory_space<smem>>
    %111 = arith.addf %106, %110 : f32
    %112 = arith.mulf %110, %110 : f32
    %113 = arith.addf %108, %112 : f32
    %114 = arith.index_cast %arg0 : i32 to index
    %c3_49 = arith.constant 3 : index
    %115 = memref.load %arg2[%114, %c3_49] : memref<3x8xf32, #tpu.memory_space<smem>>
    %116 = arith.addf %111, %115 : f32
    %117 = arith.mulf %115, %115 : f32
    %118 = arith.addf %113, %117 : f32
    %119 = arith.index_cast %arg0 : i32 to index
    %c4_50 = arith.constant 4 : index
    %120 = memref.load %arg2[%119, %c4_50] : memref<3x8xf32, #tpu.memory_space<smem>>
    %121 = arith.addf %116, %120 : f32
    %122 = arith.mulf %120, %120 : f32
    %123 = arith.addf %118, %122 : f32
    %124 = arith.index_cast %arg0 : i32 to index
    %c5_51 = arith.constant 5 : index
    %125 = memref.load %arg2[%124, %c5_51] : memref<3x8xf32, #tpu.memory_space<smem>>
    %126 = arith.addf %121, %125 : f32
    %127 = arith.mulf %125, %125 : f32
    %128 = arith.addf %123, %127 : f32
    %129 = arith.index_cast %arg0 : i32 to index
    %c6_52 = arith.constant 6 : index
    %130 = memref.load %arg2[%129, %c6_52] : memref<3x8xf32, #tpu.memory_space<smem>>
    %131 = arith.addf %126, %130 : f32
    %132 = arith.mulf %130, %130 : f32
    %133 = arith.addf %128, %132 : f32
    %134 = arith.index_cast %arg0 : i32 to index
    %c7_53 = arith.constant 7 : index
    %135 = memref.load %arg2[%134, %c7_53] : memref<3x8xf32, #tpu.memory_space<smem>>
    %136 = arith.addf %131, %135 : f32
    %137 = arith.mulf %135, %135 : f32
    %138 = arith.addf %133, %137 : f32
    %cst_54 = arith.constant 8.000000e+00 : f32
    %139 = arith.divf %136, %cst_54 : f32
    %140 = arith.mulf %90, %139 : f32
    %cst_55 = arith.constant 8.000000e+00 : f32
    %141 = arith.divf %138, %cst_55 : f32
    %142 = arith.mulf %96, %141 : f32
    %143 = arith.mulf %140, %140 : f32
    %144 = arith.subf %142, %143 : f32
    %cst_56 = arith.constant 9.99999974E-6 : f32
    %145 = arith.addf %144, %cst_56 : f32
    %146 = math.rsqrt %145 : f32
    %147 = arith.index_cast %arg0 : i32 to index
    %148 = memref.load %arg5[%147] : memref<3xf32, #tpu.memory_space<smem>>
    %149 = arith.mulf %146, %148 : f32
    %150 = arith.index_cast %arg0 : i32 to index
    %151 = memref.load %arg6[%150] : memref<3xf32, #tpu.memory_space<smem>>
    %152 = arith.mulf %140, %149 : f32
    %153 = arith.subf %151, %152 : f32
    %154 = arith.index_cast %arg0 : i32 to index
    %c0_57 = arith.constant 0 : index
    %155 = memref.load %arg2[%154, %c0_57] : memref<3x8xf32, #tpu.memory_space<smem>>
    %156 = arith.mulf %155, %149 : f32
    %157 = vector.broadcast %156 : f32 to vector<2x256xf32>
    %158 = arith.mulf %82, %157 : vector<2x256xf32>
    %159 = vector.broadcast %153 : f32 to vector<2x256xf32>
    %160 = arith.addf %158, %159 : vector<2x256xf32>
    %cst_58 = arith.constant 0.000000e+00 : f32
    %161 = vector.broadcast %cst_58 : f32 to vector<2x256xf32>
    %162 = arith.maximumf %160, %161 : vector<2x256xf32>
    %c0_59 = arith.constant 0 : index
    %c0_60 = arith.constant 0 : index
    %c0_61 = arith.constant 0 : index
    %c0_62 = arith.constant 0 : index
    %163 = vector.load %arg9[%c0_59, %c0_60, %c0_61, %c0_62] : memref<2x1x8x256xf32, #tpu.memory_space<vmem>>, vector<2x1x1x256xf32>
    %164 = vector.shape_cast %163 : vector<2x1x1x256xf32> to vector<2x256xf32>
    %165 = vector.shape_cast %162 : vector<2x256xf32> to vector<2x1x1x256xf32>
    tpu.vector_store %arg9[%c0_59, %c0_60, %c0_61, %c0_62], %165 {strides = array<i32>} : memref<2x1x8x256xf32, #tpu.memory_space<vmem>>, vector<2x1x1x256xf32>,
    %166 = arith.index_cast %arg0 : i32 to index
    %c1_63 = arith.constant 1 : index
    %167 = memref.load %arg2[%166, %c1_63] : memref<3x8xf32, #tpu.memory_space<smem>>
    %168 = arith.mulf %167, %149 : f32
    %169 = vector.broadcast %168 : f32 to vector<2x256xf32>
    %170 = arith.mulf %82, %169 : vector<2x256xf32>
    %171 = vector.broadcast %153 : f32 to vector<2x256xf32>
    %172 = arith.addf %170, %171 : vector<2x256xf32>
    %cst_64 = arith.constant 0.000000e+00 : f32
    %173 = vector.broadcast %cst_64 : f32 to vector<2x256xf32>
    %174 = arith.maximumf %172, %173 : vector<2x256xf32>
    %c0_65 = arith.constant 0 : index
    %c0_66 = arith.constant 0 : index
    %c1_67 = arith.constant 1 : index
    %c0_68 = arith.constant 0 : index
    %175 = vector.load %arg9[%c0_65, %c0_66, %c1_67, %c0_68] : memref<2x1x8x256xf32, #tpu.memory_space<vmem>>, vector<2x1x1x256xf32>
    %176 = vector.shape_cast %175 : vector<2x1x1x256xf32> to vector<2x256xf32>
    %177 = vector.shape_cast %174 : vector<2x256xf32> to vector<2x1x1x256xf32>
    tpu.vector_store %arg9[%c0_65, %c0_66, %c1_67, %c0_68], %177 {strides = array<i32>} : memref<2x1x8x256xf32, #tpu.memory_space<vmem>>, vector<2x1x1x256xf32>,
    %178 = arith.index_cast %arg0 : i32 to index
    %c2_69 = arith.constant 2 : index
    %179 = memref.load %arg2[%178, %c2_69] : memref<3x8xf32, #tpu.memory_space<smem>>
    %180 = arith.mulf %179, %149 : f32
    %181 = vector.broadcast %180 : f32 to vector<2x256xf32>
    %182 = arith.mulf %82, %181 : vector<2x256xf32>
    %183 = vector.broadcast %153 : f32 to vector<2x256xf32>
    %184 = arith.addf %182, %183 : vector<2x256xf32>
    %cst_70 = arith.constant 0.000000e+00 : f32
    %185 = vector.broadcast %cst_70 : f32 to vector<2x256xf32>
    %186 = arith.maximumf %184, %185 : vector<2x256xf32>
    %c0_71 = arith.constant 0 : index
    %c0_72 = arith.constant 0 : index
    %c2_73 = arith.constant 2 : index
    %c0_74 = arith.constant 0 : index
    %187 = vector.load %arg9[%c0_71, %c0_72, %c2_73, %c0_74] : memref<2x1x8x256xf32, #tpu.memory_space<vmem>>, vector<2x1x1x256xf32>
    %188 = vector.shape_cast %187 : vector<2x1x1x256xf32> to vector<2x256xf32>
    %189 = vector.shape_cast %186 : vector<2x256xf32> to vector<2x1x1x256xf32>
    tpu.vector_store %arg9[%c0_71, %c0_72, %c2_73, %c0_74], %189 {strides = array<i32>} : memref<2x1x8x256xf32, #tpu.memory_space<vmem>>, vector<2x1x1x256xf32>,
    %190 = arith.index_cast %arg0 : i32 to index
    %c3_75 = arith.constant 3 : index
    %191 = memref.load %arg2[%190, %c3_75] : memref<3x8xf32, #tpu.memory_space<smem>>
    %192 = arith.mulf %191, %149 : f32
    %193 = vector.broadcast %192 : f32 to vector<2x256xf32>
    %194 = arith.mulf %82, %193 : vector<2x256xf32>
    %195 = vector.broadcast %153 : f32 to vector<2x256xf32>
    %196 = arith.addf %194, %195 : vector<2x256xf32>
    %cst_76 = arith.constant 0.000000e+00 : f32
    %197 = vector.broadcast %cst_76 : f32 to vector<2x256xf32>
    %198 = arith.maximumf %196, %197 : vector<2x256xf32>
    %c0_77 = arith.constant 0 : index
    %c0_78 = arith.constant 0 : index
    %c3_79 = arith.constant 3 : index
    %c0_80 = arith.constant 0 : index
    %199 = vector.load %arg9[%c0_77, %c0_78, %c3_79, %c0_80] : memref<2x1x8x256xf32, #tpu.memory_space<vmem>>, vector<2x1x1x256xf32>
    %200 = vector.shape_cast %199 : vector<2x1x1x256xf32> to vector<2x256xf32>
    %201 = vector.shape_cast %198 : vector<2x256xf32> to vector<2x1x1x256xf32>
    tpu.vector_store %arg9[%c0_77, %c0_78, %c3_79, %c0_80], %201 {strides = array<i32>} : memref<2x1x8x256xf32, #tpu.memory_space<vmem>>, vector<2x1x1x256xf32>,
    %202 = arith.index_cast %arg0 : i32 to index
    %c4_81 = arith.constant 4 : index
    %203 = memref.load %arg2[%202, %c4_81] : memref<3x8xf32, #tpu.memory_space<smem>>
    %204 = arith.mulf %203, %149 : f32
    %205 = vector.broadcast %204 : f32 to vector<2x256xf32>
    %206 = arith.mulf %82, %205 : vector<2x256xf32>
    %207 = vector.broadcast %153 : f32 to vector<2x256xf32>
    %208 = arith.addf %206, %207 : vector<2x256xf32>
    %cst_82 = arith.constant 0.000000e+00 : f32
    %209 = vector.broadcast %cst_82 : f32 to vector<2x256xf32>
    %210 = arith.maximumf %208, %209 : vector<2x256xf32>
    %c0_83 = arith.constant 0 : index
    %c0_84 = arith.constant 0 : index
    %c4_85 = arith.constant 4 : index
    %c0_86 = arith.constant 0 : index
    %211 = vector.load %arg9[%c0_83, %c0_84, %c4_85, %c0_86] : memref<2x1x8x256xf32, #tpu.memory_space<vmem>>, vector<2x1x1x256xf32>
    %212 = vector.shape_cast %211 : vector<2x1x1x256xf32> to vector<2x256xf32>
    %213 = vector.shape_cast %210 : vector<2x256xf32> to vector<2x1x1x256xf32>
    tpu.vector_store %arg9[%c0_83, %c0_84, %c4_85, %c0_86], %213 {strides = array<i32>} : memref<2x1x8x256xf32, #tpu.memory_space<vmem>>, vector<2x1x1x256xf32>,
    %214 = arith.index_cast %arg0 : i32 to index
    %c5_87 = arith.constant 5 : index
    %215 = memref.load %arg2[%214, %c5_87] : memref<3x8xf32, #tpu.memory_space<smem>>
    %216 = arith.mulf %215, %149 : f32
    %217 = vector.broadcast %216 : f32 to vector<2x256xf32>
    %218 = arith.mulf %82, %217 : vector<2x256xf32>
    %219 = vector.broadcast %153 : f32 to vector<2x256xf32>
    %220 = arith.addf %218, %219 : vector<2x256xf32>
    %cst_88 = arith.constant 0.000000e+00 : f32
    %221 = vector.broadcast %cst_88 : f32 to vector<2x256xf32>
    %222 = arith.maximumf %220, %221 : vector<2x256xf32>
    %c0_89 = arith.constant 0 : index
    %c0_90 = arith.constant 0 : index
    %c5_91 = arith.constant 5 : index
    %c0_92 = arith.constant 0 : index
    %223 = vector.load %arg9[%c0_89, %c0_90, %c5_91, %c0_92] : memref<2x1x8x256xf32, #tpu.memory_space<vmem>>, vector<2x1x1x256xf32>
    %224 = vector.shape_cast %223 : vector<2x1x1x256xf32> to vector<2x256xf32>
    %225 = vector.shape_cast %222 : vector<2x256xf32> to vector<2x1x1x256xf32>
    tpu.vector_store %arg9[%c0_89, %c0_90, %c5_91, %c0_92], %225 {strides = array<i32>} : memref<2x1x8x256xf32, #tpu.memory_space<vmem>>, vector<2x1x1x256xf32>,
    %226 = arith.index_cast %arg0 : i32 to index
    %c6_93 = arith.constant 6 : index
    %227 = memref.load %arg2[%226, %c6_93] : memref<3x8xf32, #tpu.memory_space<smem>>
    %228 = arith.mulf %227, %149 : f32
    %229 = vector.broadcast %228 : f32 to vector<2x256xf32>
    %230 = arith.mulf %82, %229 : vector<2x256xf32>
    %231 = vector.broadcast %153 : f32 to vector<2x256xf32>
    %232 = arith.addf %230, %231 : vector<2x256xf32>
    %cst_94 = arith.constant 0.000000e+00 : f32
    %233 = vector.broadcast %cst_94 : f32 to vector<2x256xf32>
    %234 = arith.maximumf %232, %233 : vector<2x256xf32>
    %c0_95 = arith.constant 0 : index
    %c0_96 = arith.constant 0 : index
    %c6_97 = arith.constant 6 : index
    %c0_98 = arith.constant 0 : index
    %235 = vector.load %arg9[%c0_95, %c0_96, %c6_97, %c0_98] : memref<2x1x8x256xf32, #tpu.memory_space<vmem>>, vector<2x1x1x256xf32>
    %236 = vector.shape_cast %235 : vector<2x1x1x256xf32> to vector<2x256xf32>
    %237 = vector.shape_cast %234 : vector<2x256xf32> to vector<2x1x1x256xf32>
    tpu.vector_store %arg9[%c0_95, %c0_96, %c6_97, %c0_98], %237 {strides = array<i32>} : memref<2x1x8x256xf32, #tpu.memory_space<vmem>>, vector<2x1x1x256xf32>,
    %238 = arith.index_cast %arg0 : i32 to index
    %c7_99 = arith.constant 7 : index
    %239 = memref.load %arg2[%238, %c7_99] : memref<3x8xf32, #tpu.memory_space<smem>>
    %240 = arith.mulf %239, %149 : f32
    %241 = vector.broadcast %240 : f32 to vector<2x256xf32>
    %242 = arith.mulf %82, %241 : vector<2x256xf32>
    %243 = vector.broadcast %153 : f32 to vector<2x256xf32>
    %244 = arith.addf %242, %243 : vector<2x256xf32>
    %cst_100 = arith.constant 0.000000e+00 : f32
    %245 = vector.broadcast %cst_100 : f32 to vector<2x256xf32>
    %246 = arith.maximumf %244, %245 : vector<2x256xf32>
    %c0_101 = arith.constant 0 : index
    %c0_102 = arith.constant 0 : index
    %c7_103 = arith.constant 7 : index
    %c0_104 = arith.constant 0 : index
    %247 = vector.load %arg9[%c0_101, %c0_102, %c7_103, %c0_104] : memref<2x1x8x256xf32, #tpu.memory_space<vmem>>, vector<2x1x1x256xf32>
    %248 = vector.shape_cast %247 : vector<2x1x1x256xf32> to vector<2x256xf32>
    %249 = vector.shape_cast %246 : vector<2x256xf32> to vector<2x1x1x256xf32>
    tpu.vector_store %arg9[%c0_101, %c0_102, %c7_103, %c0_104], %249 {strides = array<i32>} : memref<2x1x8x256xf32, #tpu.memory_space<vmem>>, vector<2x1x1x256xf32>,
    return
  }
  func.func @transform_0(%arg0: i32) -> (i32, i32) {
    %c0_i32 = arith.constant 0 : i32
    %c0_i32_0 = arith.constant 0 : i32
    %c0_i32_1 = arith.constant 0 : i32
    return %c0_i32, %c0_i32_0 : i32, i32
  }
  func.func @transform_1(%arg0: i32) -> (i32, i32) {
    %c0_i32 = arith.constant 0 : i32
    %c0_i32_0 = arith.constant 0 : i32
    %c0_i32_1 = arith.constant 0 : i32
    return %c0_i32, %c0_i32_0 : i32, i32
  }
  func.func @transform_2(%arg0: i32) -> i32 {
    %c0_i32 = arith.constant 0 : i32
    %c0_i32_0 = arith.constant 0 : i32
    return %c0_i32 : i32
  }
  func.func @transform_3(%arg0: i32) -> i32 {
    %c0_i32 = arith.constant 0 : i32
    %c0_i32_0 = arith.constant 0 : i32
    return %c0_i32 : i32
  }
  func.func @transform_4(%arg0: i32) -> i32 {
    %c0_i32 = arith.constant 0 : i32
    %c0_i32_0 = arith.constant 0 : i32
    return %c0_i32 : i32
  }
  func.func @transform_5(%arg0: i32) -> i32 {
    %c0_i32 = arith.constant 0 : i32
    %c0_i32_0 = arith.constant 0 : i32
    return %c0_i32 : i32
  }
  func.func @transform_6(%arg0: i32) -> (i32, i32, i32, i32) {
    %c0_i32 = arith.constant 0 : i32
    %c0_i32_0 = arith.constant 0 : i32
    %c0_i32_1 = arith.constant 0 : i32
    %c0_i32_2 = arith.constant 0 : i32
    return %c0_i32, %arg0, %c0_i32_0, %c0_i32_1 : i32, i32, i32, i32
  }
  func.func @transform_7(%arg0: i32) -> (i32, i32, i32) {
    %c0_i32 = arith.constant 0 : i32
    %c0_i32_0 = arith.constant 0 : i32
    %c0_i32_1 = arith.constant 0 : i32
    return %arg0, %c0_i32, %c0_i32_0 : i32, i32, i32
  }
  func.func @transform_8(%arg0: i32) -> (i32, i32, i32, i32) {
    %c0_i32 = arith.constant 0 : i32
    %c0_i32_0 = arith.constant 0 : i32
    %c0_i32_1 = arith.constant 0 : i32
    %c0_i32_2 = arith.constant 0 : i32
    return %c0_i32, %arg0, %c0_i32_0, %c0_i32_1 : i32, i32, i32, i32
  }
}

</mosaic_0001>

<bundles_post_ra>
// kernel: tpu_custom_call.1
= control target key start
LH: loop header
LB: loop body
LE: loop exit
PB: predicated region body
PF: predicated region fallthrough
CT: control target
= control target key end

     0   :  { %s1991_s0 = inlined_call_operand.hbm [shape: f32[3,8], index: 0, kind: input, shape index: {}]   ;;  %s1992_s1 = inlined_call_operand.hbm [shape: f32[3,8], index: 1, kind: input, shape index: {}]   ;;  %s1993_s2 = inlined_call_operand.vmem [shape: f32[3], index: 2, kind: input, shape index: {}]   ;;  %s1994_s3 = inlined_call_operand.vmem [shape: f32[3], index: 3, kind: input, shape index: {}]   ;;  %s1995_s4 = inlined_call_operand.vmem [shape: f32[3], index: 4, kind: input, shape index: {}]   ;;  %s1996_s5 = inlined_call_operand.vmem [shape: f32[3], index: 5, kind: input, shape index: {}]   ;;  %s1997_s6 = inlined_call_operand.hbm [shape: f32[2,3,8,256], index: 6, kind: input, shape index: {}]   ;;  %s1998_s7 = inlined_call_operand.hbm [shape: f32[3,2,256], index: 7, kind: output, shape index: {0}]   ;;  %s1999_s8 = inlined_call_operand.hbm [shape: f32[2,3,8,256], index: 8, kind: output, shape index: {1}]  }
   0x1   :  { %2017 = sst [smem:[#allocation40_spill]] %s1991_s0 }
   0x2   :  { %2018 = sst [smem:[#allocation41_spill]] %s1992_s1 }
   0x3   :  { %2019 = sst [smem:[#allocation42_spill]] %s1993_s2 }
   0x4   :  { %2020 = sst [smem:[#allocation43_spill]] %s1994_s3 }
   0x5   :  { %2021 = sst [smem:[#allocation44_spill]] %s1995_s4 }
   0x6   :  { %2022 = sst [smem:[#allocation45_spill]] %s1996_s5 }
   0x7   :  { %2023 = sst [smem:[#allocation46_spill]] %s1997_s6 }
   0x8   :  { %2024 = sst [smem:[#allocation47_spill]] %s1998_s7 }
   0x9   :  { %2025 = sst [smem:[#allocation48_spill]] %s1999_s8 }
   0xa   :  { %14 = vsyncpa [#allocation5], 0 }
   0xb   :  { %15 = vsyncpa [#allocation8], 0 }
   0xc   :  { %16 = vsyncpa [#allocation6], 0 }
   0xd   :  { %17 = vsyncpa [#allocation11], 0 }
   0xe   :  { %18 = vsyncpa [#allocation14], 0 }
   0xf   :  { %19 = vsyncpa [#allocation3], 0 }
  0x10   :  { %21 = vsyncpa [#allocation3 + $0x1], 0 }
  0x11   :  { %22 = vsyncpa [#allocation4], 0 }
  0x12   :  { %24 = vsyncpa [#allocation4 + $0x1], 0 }
  0x13   :  { %25 = vsyncpa [#allocation18], 0 }
  0x14   :  { %27 = vsyncpa [#allocation18 + $0x1], 0  ;;  %s1526_s27 = smov 0   ;;  %s1528_s28 = smov 0  }
  0x15   :  { %s1530_s29 = smov 0   ;;  %s1532_s30 = smov 0  }
  0x16 LB: > { %2026 = sst [smem:[#allocation27_spill]] %s1454_s27  ;;  %s1550_s12 = sadd.s32 4294967295, %s1466_s30   ;;  %s1466_s30 = sphi %s1532_s30, %s2067_s30   ;;  %s1462_s29 = sphi %s1530_s29, %s2070_s29   ;;  %s1458_s28 = sphi %s1528_s28, %s2069_s28   ;;  %s1454_s27 = sphi %s1526_s27, %s2068_s27  }
  0x17   : > { %2027 = sst [smem:[#allocation28_spill]] %s1458_s28  ;;  %p1026_p0 = scmp.ge.s32.totalorder %s1466_s30, 1 }
  0x18   : > { %2028 = sst [smem:[#allocation29_spill]] %s1462_s29  ;;  %p180_p1 = scmp.eq.s32.totalorder %s1550_s12, 0 }
  0x19   : > { %2029 = sst [smem:[#allocation30_spill]] %s1466_s30  ;;  %p242_p2 = scmp.lt.s32.totalorder %s1466_s30, 4 }
  0x1a   : > { %s2030_s3 = sld [smem:[#allocation43_spill]]  ;;  %s1468_s24 = smov [#allocation10]  }
  0x1b   : > { %p1555_p3 = pnand %p1026_p0, %p242_p2  ;;  %s2032_s0 = sld [smem:[#allocation40_spill]] }
  0x1c   : > { %s2033_s1 = sld [smem:[#allocation41_spill]]  ;;  %s1469_s25 = smov [#allocation2]  }
  0x1d   : > { %p1133_p4 = pneg %p1555_p3  ;;  %s2035_s2 = sld [smem:[#allocation42_spill]] }
  0x1e   : > { %s1470_s26 = smov [#allocation7]   ;;  %s1471_s9 = smov [#allocation9]  }
  0x1f   : > { %p1569_p5 = pnand %p1133_p4, %p180_p1  ;;  %s2036_s4 = sld [smem:[#allocation44_spill]] }
  0x20   : > { %s284_s11 = sshll.u32 %s2030_s3, 4  ;;  %s2037_s5 = sld [smem:[#allocation45_spill]]  ;;  %s285_s11 = int_to_ptr.vmem [resolvable:$true] %s284_s11 }
  0x21   : > { %s254_s16 = sshll.u32 %s2032_s0, 4  ;;  %s1472_s18 = smov [#allocation12]   ;;  %s255_s16 = int_to_ptr.hbm [resolvable:$true] %s254_s16 }
  0x22   : > { %s264_s19 = sshll.u32 %s2033_s1, 4  ;;  %s1025_s21 = sadd.s32 4294967294, %s1466_s30   ;;  %s265_s19 = int_to_ptr.hbm [resolvable:$true] %s264_s19 }
  0x23   : > { %s274_s23 = sshll.u32 %s2035_s2, 4  ;;  %s1596_s22 = sadd.s32 1, %s1466_s30   ;;  %s275_s23 = int_to_ptr.vmem [resolvable:$true] %s274_s23 }
  0x24   : > { %1145 = dma.vmem_to_smem (!%p1569_p5), %s285_s11, 16, %s1468_s24, [#allocation11]  }
  0x25   : > { %1136 = dma.hbm_to_smem (!%p1569_p5), %s255_s16, 64, %s1469_s25, [#allocation5]  }
  0x26   : > { %1139 = dma.hbm_to_smem (!%p1569_p5), %s265_s19, 64, %s1470_s26, [#allocation8]  }
  0x27   : > { %1142 = dma.vmem_to_smem (!%p1569_p5), %s275_s23, 16, %s1471_s9, [#allocation6]  }
  0x28   : > { %s294_s11 = sshll.u32 %s2036_s4, 4  ;;  %s304_s17 = sshll.u32 %s2037_s5, 4  ;;  %s295_s11 = int_to_ptr.vmem [resolvable:$true] %s294_s11  ;;  %s305_s17 = int_to_ptr.vmem [resolvable:$true] %s304_s17 }
  0x29   : > { %1148 = dma.vmem_to_smem (!%p1569_p5), %s295_s11, 16, %s1472_s18, [#allocation11]  }
  0x2a   : > { %s1473_s19 = smov [#allocation13]   ;;  %2038 = sst [smem:[#allocation31_spill]] %s1596_s22 }
  0x2b   : > { %1151 = dma.vmem_to_smem (!%p1569_p5), %s305_s17, 16, %s1473_s19, [#allocation14]  }
  0x2c   : > { %s163_s23 = ssub.s32 %s1466_s30, %s1596_s22  ;;  %s166_s24 = sadd.s32 1, %s1462_s29 }
  0x2d   : > { %p164_p6 = scmp.eq.s32.totalorder %s163_s23, 0  ;;  %p173_p7 = scmp.ne.s32.totalorder %s1462_s29, %s1458_s28 }
  0x2e   : > { %p174_p8 = scmp.eq.s32.totalorder %s1466_s30, 0  ;;  %p179_p9 = scmp.ne.s32.totalorder %s1458_s28, %s1454_s27 }
  0x2f   : > { %s1607_s25 = scalar_select %p164_p6, %s1462_s29, %s166_s24  }
  0x30   : > { %p1609_p10 = por %p174_p8, %p173_p7  ;;  %p1615_p11 = por %p180_p1, %p179_p9 }
  0x31   : > { %2039 = sst [smem:[#allocation32_spill]] %s1607_s25  ;;  %p203_p12 = scmp.eq.s32.totalorder %s1550_s12, 2 }
  0x32   : > { %p209_p13 = scmp.eq.s32.totalorder %s1025_s21, 2  ;;  %p1169_p0 = scmp.lt.s32.totalorder %s1466_s30, 3 }
  0x33   : > { %s315_s9 = sand.u32 1, %s1462_s29   ;;  %p1622_p2 = por %p203_p12, %p173_p7 }
  0x34   : > { %p1626_p4 = por %p209_p13, %p179_p9  ;;  %s1034_s11 = sshll.u32 %s315_s9, 5 }
  0x35   : > { %s2042_s10 = scalar_select %p1622_p2, 1, 0 }
  0x36   : > { %s2044_s14 = scalar_select %p1626_p4, 1, 0 }
  0x37   : > { %2043 = sst [smem:[#allocation33_spill]] %s2042_s10  ;;  %s1086_s15 = sshll.u32 %s1466_s30, 4 }
  0x38   : > { %2045 = sst [smem:[#allocation34_spill]] %s2044_s14  ;;  %s319_s19 = scalar_lea.vmem [#allocation15], %s1034_s11 }
  0x39   : > { %s2046_s6 = sld [smem:[#allocation46_spill]]  ;;  %s327_s23 = sshll.u32 %s319_s19, 4  ;;  %s328_s23 = int_to_ptr.vmem [resolvable:$true] %s327_s23 }
  0x3a   : > { %p1636_p5 = pnand %p1169_p0, %p1609_p10  ;;  %s316_s0 = scalar_lea.sflag [#allocation3], %s315_s9 }
  0x3c   : > { %p1322_p7 = pneg %p1636_p5 }
  0x3f   : > { %s324_s18 = scalar_lea.hbm %s2046_s6, %s1086_s15  ;;  %s1325_s16 = scalar_lea.hbm %s2046_s6, 96 }
  0x40   : > { %s325_s24 = sshll.u32 %s324_s18, 4  ;;  %s326_s24 = int_to_ptr.hbm [resolvable:$true] %s325_s24 }
  0x41   : > { %s1318_s1 = sshra.s32 %s326_s24, 4  ;;  %s1319_s1 = int_to_ptr.hbm [resolvable:$true] %s1318_s1 }
  0x42   : > { %s1320_s2 = scalar_lea.hbm %s1319_s1, 32  ;;  %p1326_p10 = scmp.lt.s32.totalorder %s1319_s1, %s2046_s6 }
  0x43   : > { %p1321_p6 = scmp.ne.s32.totalorder %s1319_s1, %s1320_s2  ;;  %p1327_p12 = scmp.lt.s32.totalorder %s1325_s16, %s1320_s2 }
  0x45   : > { %p1323_p8 = pnand %p1322_p7, %p1321_p6  ;;  %p1328_p13 = por %p1327_p12, %p1326_p10 }
  0x47   : > { %p1324_p9 = pneg %p1323_p8 }
  0x49   : > { %p1329_p0 = pnand %p1328_p13, %p1324_p9 }
  0x4b   : > { %1332 = shalt.err (!%p1329_p0)
}
  0x4c   : > { %s1474_s9 = smov 768   ;;  %s1475_s18 = smov 256  }
  0x4d   : > { %s1476_s19 = smov 16   ;;  %339 = sbr.rel (%p1555_p3) target bundleno = 727 (0x2d7), region = 48 }
  0x4e   : > { %1155 = dma.hbm_to_vmem [thread:$0]  (!%p1636_p5), %s326_s24, 512, %s328_s23, %s316_s0, %s1474_s9, %s1475_s18, %s1476_s19  }
  0x52   : > { %1421 = dma.done.wait (%p180_p1), [#allocation5], 64  }
  0x53   : > { %1423 = vsyncadd (%p180_p1), [#allocation5], 4294967232 }
  0x54   : > { %1425 = dma.done.wait (%p180_p1), [#allocation8], 64  }
  0x55   : > { %1427 = vsyncadd (%p180_p1), [#allocation8], 4294967232 }
  0x56   : > { %1429 = dma.done.wait (%p180_p1), [#allocation6], 16  }
  0x57   : > { %1431 = vsyncadd (%p180_p1), [#allocation6], 4294967280 }
  0x58   : > { %1433 = dma.done.wait (%p180_p1), [#allocation11], 32  }
  0x59   : > { %1435 = vsyncadd (%p180_p1), [#allocation11], 4294967264 }
  0x5a   : > { %1437 = dma.done.wait (%p180_p1), [#allocation14], 16  }
  0x5b   : > { %1439 = vsyncadd (%p180_p1), [#allocation14], 4294967280  ;;  %s1673_s0 = sand.u32 1, %s1458_s28  }
  0x5c   : > { %2048 = sst [smem:[#allocation35_spill]] %s1673_s0  ;;  %s2000_s1 = sshll.u32 %s1673_s0, 5 }
  0x5d   : > { %s372_s2 = scalar_lea.sflag [#allocation3], %s1673_s0  ;;  %s1679_s13 = scalar_lea.vmem [#allocation15], %s2000_s1 }
  0x5e   : > { %1441 = dma.done.wait (%p1615_p11), %s372_s2, 512  }
  0x5f   : > { %1443 = vsyncadd (%p1615_p11), %s372_s2, 4294966784 }
  0x60   : > { %381 = sfence }
  0x61   : > { %s1686_s23 = sshll.u32 %s1550_s12, 7  ;;  %v415_v0 = vld [vmem:[%s1679_s13] ss:$8 sm:$0x3]  ;;  %vm509_vm0 = vcmask 1041408   ;;  %s1087_s14 = sshll.u32 %s1550_s12, 2 }
  0x62   : > { %s419_s24 = sld [smem:[#allocation2 + %s1686_s23]]  ;;  %s1690_s21 = sadd.s32 1, %s1686_s23  ;;  %v1047_v1 = vld [vmem:[%s1679_s13 + $0x10] ss:$8 sm:$0x3] }
  0x63   : > { %s428_s20 = sld [smem:[#allocation2 + %s1690_s21]]  ;;  %s1694_s11 = sadd.s32 2, %s1686_s23  ;;  %v1049_v2 = vld [vmem:[%s1679_s13 + $0x1] ss:$8 sm:$0x3] }
  0x64   : > { %s439_s15 = sld [smem:[#allocation2 + %s1694_s11]]  ;;  %s1698_s16 = sadd.s32 3, %s1686_s23  ;;  %v1050_v3 = vld [vmem:[%s1679_s13 + $0x11] ss:$8 sm:$0x3] }
  0x65   : > { %2049 = sst [smem:[#allocation36_spill]] %s1698_s16  ;;  %s1705_s26 = sadd.s32 4, %s1686_s23  ;;  %v1051_v5 = vld [vmem:[%s1679_s13 + $0x2] ss:$8 sm:$0x3] }
  0x66   : > { %s450_s17 = sld [smem:[#allocation2 + %s1698_s16]]  ;;  %s1712_s18 = sadd.s32 5, %s1686_s23  ;;  %v1052_v6 = vld [vmem:[%s1679_s13 + $0x12] ss:$8 sm:$0x3] }
  0x67   : > { %2050 = sst [smem:[#allocation37_spill]] %s1705_s26  ;;  %v1053_v10 = vld [vmem:[%s1679_s13 + $0x3] ss:$8 sm:$0x3]  ;;  %s1721_s2 = sadd.s32 6, %s1686_s23 }
  0x68   : > { %s1709_s9 = sld [smem:[#allocation2 + %s1705_s26]]  ;;  %v420_v4 = vstv %s419_s24  ;;  %v1054_v14 = vld [vmem:[%s1679_s13 + $0x13] ss:$8 sm:$0x3]  ;;  %s1728_s1 = sadd.s32 7, %s1686_s23 }
  0x69   : > { %2051 = sst [smem:[#allocation38_spill]] %s1712_s18  ;;  %v421_v7 = vmul.f32 %v420_v4, %v415_v0  ;;  %v422_v8 = vmul.f32 %v1047_v1, %v420_v4  ;;  %v429_v9 = vstv %s428_s20  ;;  %v1055_v17 = vld [vmem:[%s1679_s13 + $0x4] ss:$8 sm:$0x3] }
  0x6a   : > { %s1718_s19 = sld [smem:[#allocation2 + %s1712_s18]]  ;;  %v430_v11 = vmul.f32 %v1049_v2, %v429_v9  ;;  %v431_v12 = vmul.f32 %v1050_v3, %v429_v9  ;;  %v440_v13 = vstv %s439_s15  ;;  %v1056_v18 = vld [vmem:[%s1679_s13 + $0x14] ss:$8 sm:$0x3] }
  0x6b   : > { %s1725_s24 = sld [smem:[#allocation2 + %s1721_s2]]  ;;  %v441_v15 = vmul.f32 %v1051_v5, %v440_v13  ;;  %v442_v16 = vmul.f32 %v1052_v6, %v440_v13  ;;  %v1057_v25 = vld [vmem:[%s1679_s13 + $0x5] ss:$8 sm:$0x3] }
  0x6c   : > { %v432_v19 = vadd.f32 %v430_v11, %v421_v7  ;;  %v433_v20 = vadd.f32 %v431_v12, %v422_v8  ;;  %v451_v21 = vstv %s450_s17  ;;  %s494_s20 = sld [smem:[#allocation2 + %s1728_s1]]  ;;  %v1058_v26 = vld [vmem:[%s1679_s13 + $0x15] ss:$8 sm:$0x3] }
  0x6d   : > { %v452_v22 = vmul.f32 %v1053_v10, %v451_v21  ;;  %v453_v23 = vmul.f32 %v1054_v14, %v451_v21  ;;  %v1059_v32 = vld [vmem:[%s1679_s13 + $0x6] ss:$8 sm:$0x3]  ;;  %v1060_v33 = vld [vmem:[%s1679_s13 + $0x16] ss:$8 sm:$0x3] }
  0x6e   : > { %v462_v24 = vstv %s1709_s9  ;;  %v443_v27 = vadd.f32 %v441_v15, %v432_v19  ;;  %v444_v28 = vadd.f32 %v442_v16, %v433_v20  ;;  %v1061_v39 = vld [vmem:[%s1679_s13 + $0x7] ss:$8 sm:$0x3]  ;;  %v1062_v40 = vld [vmem:[%s1679_s13 + $0x17] ss:$8 sm:$0x3] }
  0x6f   : > { %v463_v29 = vmul.f32 %v1055_v17, %v462_v24  ;;  %v464_v30 = vmul.f32 %v1056_v18, %v462_v24  ;;  %s1792_s4 = sld [smem:[#allocation7 + %s1705_s26]] }
  0x70   : > { %v473_v31 = vstv %s1718_s19  ;;  %v454_v34 = vadd.f32 %v452_v22, %v443_v27  ;;  %v455_v35 = vadd.f32 %v453_v23, %v444_v28  ;;  %s1804_s27 = sld [smem:[#allocation7 + %s1712_s18]] }
  0x71   : > { %v474_v36 = vmul.f32 %v1057_v25, %v473_v31  ;;  %v475_v37 = vmul.f32 %v1058_v26, %v473_v31  ;;  %v484_v38 = vstv %s1725_s24  ;;  %s2053_s7 = sld [smem:[#allocation47_spill]] }
  0x72   : > { %v465_v41 = vadd.f32 %v463_v29, %v454_v34  ;;  %v466_v42 = vadd.f32 %v464_v30, %v455_v35  ;;  %v485_v43 = vmul.f32 %v1059_v32, %v484_v38  ;;  %v486_v44 = vmul.f32 %v1060_v33, %v484_v38 }
  0x73   : > { %v495_v45 = vstv %s494_s20 }
  0x74   : > { %v476_v46 = vadd.f32 %v474_v36, %v465_v41  ;;  %v477_v47 = vadd.f32 %v475_v37, %v466_v42  ;;  %v496_v48 = vmul.f32 %v1061_v39, %v495_v45  ;;  %v497_v49 = vmul.f32 %v1062_v40, %v495_v45 }
  0x75   : > { %v1477_v45 = vmov 8.0   ;;  %s643_s22 = smul.f32 %s1792_s4, %s1792_s4 }
  0x76   : > { %v487_v50 = vadd.f32 %v485_v43, %v476_v46  ;;  %v488_v51 = vadd.f32 %v486_v44, %v477_v47 }
  0x77   : > { %s837_s8 = scalar_lea.hbm %s2053_s7, %s1087_s14 }
  0x78   : > { %v1742_v52 = vadd.f32 %v496_v48, %v487_v50  ;;  %v1744_v53 = vadd.f32 %v497_v49, %v488_v51 }
  0x7a   : > { %502 = vst [vmem:[#allocation1] ss:$9 sm:$0xff] %v1742_v52  ;;  %v523_v54 = vmul.f32 %v1742_v52, %v1742_v52  ;;  %v524_v55 = vmul.f32 %v1744_v53, %v1744_v53 }
  0x7b   : > { %504 = vst [vmem:[#allocation1 + $0x1] ss:$9 sm:$0xff] %v1744_v53 }
  0x82   : > { %v505_v56 = vld [vmem:[#allocation1] sm:$0xff]  ;;  %v506_v57 = vld [vmem:[#allocation1 + $0x9] sm:$0xff] }
  0x83   : > { %v510_v58 = vsel %vm509_vm0, %v505_v56, 0.0  ;;  %v511_v59 = vsel %vm509_vm0, %v506_v57, 0.0  ;;  %527 = vst [vmem:[#allocation1] ss:$9 sm:$0xff] %v523_v54 }
  0x84   : > { %v512_v60 = vadd.f32 %v511_v59, %v510_v58  ;;  %529 = vst [vmem:[#allocation1 + $0x1] ss:$9 sm:$0xff] %v524_v55 }
  0x86   : > { %513 = vadd.xlane.f32.xlu0 %v512_v60 }
  0x8b   : > { %v530_v61 = vld [vmem:[#allocation1] sm:$0xff]  ;;  %v531_v62 = vld [vmem:[#allocation1 + $0x9] sm:$0xff] }
  0x8c   : > { %v534_v63 = vsel %vm509_vm0, %v530_v61, 0.0  ;;  %v535_v0 = vsel %vm509_vm0, %v531_v62, 0.0 }
  0x8d   : > { %v536_v1 = vadd.f32 %v535_v0, %v534_v63 }
  0x8f   : > { %537 = vadd.xlane.f32.xlu0 %v536_v1 }
  0xf9   : > { %v514_v2 = vpop.xlane.xlu0 %513 }
  0xfa   : > { %v515_v3 = vrot.slane %v514_v2, 4 }
  0xfc   : > { %v516_v4 = vadd.f32 %v515_v3, %v514_v2 }
  0xfe   : > { %v517_v5 = vrot.slane %v516_v4, 2 }
 0x100   : > { %v518_v6 = vadd.f32 %v517_v5, %v516_v4 }
 0x102   : > { %v538_v7 = vpop.xlane.xlu0 %537  ;;  %v519_v8 = vrot.slane %v518_v6, 1 }
 0x103   : > { %v539_v9 = vrot.slane %v538_v7, 4 }
 0x104   : > { %v520_v10 = vadd.f32 %v519_v8, %v518_v6 }
 0x105   : > { %v540_v11 = vadd.f32 %v539_v9, %v538_v7 }
 0x106   : > { %1089 = vpush %v520_v10 }
 0x107   : > { %v541_v12 = vrot.slane %v540_v11, 2 }
 0x109   : > { %v542_v13 = vadd.f32 %v541_v12, %v540_v11 }
 0x10b   : > { %v543_v14 = vrot.slane %v542_v13, 1 }
 0x10d   : > { %v544_v15 = vadd.f32 %v543_v14, %v542_v13 }
 0x10f   : > { %1091 = vpush %v544_v15 }
 0x137   : > { %s1090_s13 = spop %1089 }
 0x138   : > { %s522_s15 = smul.f32 0.001953125, %s1090_s13  ;;  %s562_s13 = sld [smem:[#allocation9 + %s1550_s12]] }
 0x13a   : > { %s547_s17 = smul.f32 %s522_s15, %s522_s15 }
 0x140   : > { %s1092_s9 = spop %1091 }
 0x141   : > { %s546_s19 = smul.f32 0.001953125, %s1092_s9  ;;  %s564_s9 = sld [smem:[#allocation10 + %s1550_s12]] }
 0x143   : > { %s548_s24 = ssub.f32 %s546_s19, %s547_s17 }
 0x145   : > { %s549_s20 = sadd.f32 1e-05, %s548_s24 }
 0x147   : > { %v550_v16 = vstv %s549_s20  ;;  %s1045_s20 = sshll.u32 %s1673_s0, 2 }
 0x148   : > { %1222 = vrsqrt.f32 %v550_v16  ;;  %vm557_vm2 = vweird.f32 %v550_v16 }
 0x149   : > { %1224 = vrcp.f32 %v1477_v45 }
 0x14e   : > { %v1223_v17 = vpop.eup %1222 }
 0x14f   : > { %v552_v18 = vmul.f32 %v1223_v17, %v550_v16  ;;  %vm558_vm1 = vweird.f32 %v1223_v17  ;;  %v1225_v47 = vpop.eup %1224 }
 0x150   : > { %vm559_vm3 = vmor %vm557_vm2, %vm558_vm1  ;;  %v658_v50 = vmul.f32 8.0, %v1225_v47  ;;  %vm662_vm4 = vweird.f32 %v1225_v47 }
 0x151   : > { %v553_v19 = vmul.f32 %v1223_v17, %v552_v18 }
 0x153   : > { %v554_v20 = vmul.f32 0.5, %v553_v19 }
 0x155   : > { %v555_v21 = vsub.f32 1.5, %v554_v20 }
 0x157   : > { %v556_v22 = vmul.f32 %v1223_v17, %v555_v21 }
 0x159   : > { %v560_v23 = vsel %vm559_vm3, %v1223_v17, %v556_v22 }
 0x15a   : > { %1093 = vpush %v560_v23 }
 0x18b   : > { %s1094_s3 = spop %1093 }
 0x18c   : > { %s563_s17 = smul.f32 %s1094_s3, %s562_s13  ;;  %s1769_s3 = scalar_lea.vmem [#allocation16], %s1045_s20 }
 0x18d   : > { %s629_s13 = sld [smem:[#allocation7 + %s1690_s21]] }
 0x18e   : > { %s565_s19 = smul.f32 %s563_s17, %s522_s15  ;;  %v567_v24 = vstv %s563_s17  ;;  %s1781_s15 = sld [smem:[#allocation7 + %s1686_s23]] }
 0x18f   : > { %v568_v25 = vmul.f32 %v567_v24, %v1742_v52  ;;  %v569_v26 = vmul.f32 %v567_v24, %v1744_v53  ;;  %v659_v53 = vsub.f32 1.0, %v658_v50 }
 0x190   : > { %s566_s24 = ssub.f32 %s564_s9, %s565_s19 }
 0x191   : > { %v660_v59 = vmul.f32 %v1225_v47, %v659_v53  ;;  %s633_s9 = sld [smem:[#allocation7 + %s1694_s11]] }
 0x192   : > { %v570_v27 = vstv %s566_s24  ;;  %s1788_s24 = sld [smem:[#allocation7 + %s1698_s16]] }
 0x193   : > { %v571_v28 = vadd.f32 %v570_v27, %v568_v25  ;;  %v572_v29 = vadd.f32 %v570_v27, %v569_v26  ;;  %v661_v62 = vadd.f32 %v1225_v47, %v660_v59  ;;  %s631_s19 = smul.f32 %s629_s13, %s629_s13 }
 0x194   : > { %2052 = sst [smem:[#allocation39_spill]] %s1781_s15  ;;  %s628_s17 = smul.f32 %s1781_s15, %s1781_s15 }
 0x195   : > { %v1760_v30 = vmax.f32 %v571_v28, 0.0  ;;  %v1762_v31 = vmax.f32 %v572_v29, 0.0  ;;  %v663_v1 = vsel %vm662_vm4, %v1225_v47, %v661_v62  ;;  %s630_s20 = sadd.f32 %s629_s13, %s1781_s15  ;;  %s839_s15 = sshll.u32 %s1769_s3, 4  ;;  %s840_s15 = int_to_ptr.vmem [resolvable:$true] %s839_s15 }
 0x196   : > { %s632_s23 = sadd.f32 %s631_s19, %s628_s17  ;;  %s841_s17 = sshll.u32 %s837_s8, 4  ;;  %s842_s17 = int_to_ptr.hbm [resolvable:$true] %s841_s17 }
 0x197   : > { %577 = vst [vmem:[#allocation1] ss:$2 sm:$0xff] %v1760_v30  ;;  %v603_v33 = vmul.f32 %v1760_v30, %v1760_v30  ;;  %v604_v36 = vmul.f32 %v1762_v31, %v1762_v31  ;;  %s635_s5 = smul.f32 %s633_s9, %s633_s9  ;;  %s1794_s6 = sadd.f32 %s633_s9, %s630_s20 }
 0x198   : > { %579 = vst [vmem:[#allocation1 + $0x1] ss:$2 sm:$0xff] %v1762_v31  ;;  %s639_s28 = smul.f32 %s1788_s24, %s1788_s24  ;;  %s821_s19 = scalar_lea.sflag [#allocation4], %s1673_s0 }
 0x199   : > { %s636_s25 = sadd.f32 %s635_s5, %s632_s23  ;;  %s1362_s5 = sshra.s32 %s842_s17, 4  ;;  %s1363_s5 = int_to_ptr.hbm [resolvable:$true] %s1362_s5 }
 0x19a   : > { %s638_s29 = sadd.f32 %s1788_s24, %s1794_s6  ;;  %s1364_s6 = scalar_lea.hbm %s1363_s5, 4 }
 0x19b   : > { %s640_s9 = sadd.f32 %s639_s28, %s636_s25  ;;  %p1365_p1 = scmp.ne.s32.totalorder %s1363_s5, %s1364_s6 }
 0x19c   : > { %s1368_s23 = scalar_lea.hbm %s2053_s7, 12  ;;  %p1369_p5 = scmp.lt.s32.totalorder %s1363_s5, %s2053_s7 }
 0x19d   : > { %p1366_p3 = pnand %p1365_p1, %p1622_p2  ;;  %p1370_p6 = scmp.lt.s32.totalorder %s1368_s23, %s1364_s6 }
 0x19f   : > { %v580_v32 = vld [vmem:[#allocation1] sm:$0xff]  ;;  %p1367_p11 = pneg %p1366_p3  ;;  %p1371_p7 = por %p1370_p6, %p1369_p5 }
 0x1a0   : > { %583 = vst [vmem:[#allocation1] ss:$9 sm:$0xff] %v1760_v30 }
 0x1a1   : > { %585 = vst [vmem:[#allocation1 + $0x1] ss:$9 sm:$0xff] %v1762_v31  ;;  %p1372_p8 = pnand %p1371_p7, %p1367_p11 }
 0x1a2   : > { %582 = vst [vmem:[%s1769_s3] sm:$0xf] %v580_v32 }
 0x1a8   : > { %v586_v34 = vld [vmem:[#allocation1] sm:$0xff]  ;;  %v587_v35 = vld [vmem:[#allocation1 + $0x9] sm:$0xff] }
 0x1a9   : > { %v590_v37 = vsel %vm509_vm0, %v586_v34, 0.0  ;;  %v591_v38 = vsel %vm509_vm0, %v587_v35, 0.0  ;;  %607 = vst [vmem:[#allocation1] ss:$9 sm:$0xff] %v603_v33 }
 0x1aa   : > { %v592_v39 = vadd.f32 %v591_v38, %v590_v37  ;;  %609 = vst [vmem:[#allocation1 + $0x1] ss:$9 sm:$0xff] %v604_v36 }
 0x1ac   : > { %593 = vadd.xlane.f32.xlu1 %v592_v39 }
 0x1b1   : > { %v610_v40 = vld [vmem:[#allocation1] sm:$0xff]  ;;  %v611_v41 = vld [vmem:[#allocation1 + $0x9] sm:$0xff] }
 0x1b2   : > { %v614_v42 = vsel %vm509_vm0, %v610_v40, 0.0  ;;  %v615_v43 = vsel %vm509_vm0, %v611_v41, 0.0 }
 0x1b3   : > { %v616_v44 = vadd.f32 %v615_v43, %v614_v42 }
 0x1b5   : > { %617 = vadd.xlane.f32.xlu1 %v616_v44 }
 0x21f   : > { %v594_v46 = vpop.xlane.xlu1 %593 }
 0x220   : > { %v595_v48 = vrot.slane %v594_v46, 4 }
 0x222   : > { %v596_v49 = vadd.f32 %v595_v48, %v594_v46 }
 0x224   : > { %v597_v51 = vrot.slane %v596_v49, 2 }
 0x226   : > { %v598_v52 = vadd.f32 %v597_v51, %v596_v49 }
 0x228   : > { %v618_v54 = vpop.xlane.xlu1 %617  ;;  %v599_v55 = vrot.slane %v598_v52, 1 }
 0x229   : > { %v619_v56 = vrot.slane %v618_v54, 4 }
 0x22a   : > { %v600_v57 = vadd.f32 %v599_v55, %v598_v52 }
 0x22b   : > { %v620_v58 = vadd.f32 %v619_v56, %v618_v54 }
 0x22c   : > { %1095 = vpush %v600_v57 }
 0x22d   : > { %v621_v60 = vrot.slane %v620_v58, 2 }
 0x22f   : > { %v622_v61 = vadd.f32 %v621_v60, %v620_v58 }
 0x231   : > { %v623_v63 = vrot.slane %v622_v61, 1 }
 0x233   : > { %v624_v0 = vadd.f32 %v623_v63, %v622_v61 }
 0x235   : > { %1097 = vpush %v624_v0 }
 0x236   : > { %1099 = vpush %v663_v1 }
 0x237   : > { %1375 = shalt.err (!%p1372_p8)
}
 0x238   : > { %1129 = dma.vmem_to_hbm [thread:$0]  (%p1622_p2), %s840_s15, 64, %s842_s17, %s821_s19   ;;  %v706_v10 = vlaneseq }
 0x239   : > { %s649_s8 = sld [smem:[#allocation7 + %s1721_s2]]  ;;  %s647_s14 = smul.f32 %s1804_s27, %s1804_s27 }
 0x23a   : > { %s642_s28 = sadd.f32 %s1792_s4, %s638_s29  ;;  %vm1864_vm8 = vcmp.lt.s32.totalorder %v706_v10, 256 }
 0x23b   : > { %s644_s25 = sadd.f32 %s643_s22, %s640_s9 }
 0x23c   : > { %s653_s3 = sld [smem:[#allocation7 + %s1728_s1]] }
 0x23d   : > { %s646_s18 = sadd.f32 %s1804_s27, %s642_s28 }
 0x23e   : > { %s648_s13 = sadd.f32 %s647_s14, %s644_s25 }
 0x23f   : > { %s651_s5 = smul.f32 %s649_s8, %s649_s8  ;;  %s650_s6 = sadd.f32 %s649_s8, %s646_s18 }
 0x240   : > { %s2054_s19 = sld [smem:[#allocation36_spill]] }
 0x241   : > { %s652_s24 = sadd.f32 %s651_s5, %s648_s13 }
 0x242   : > { %s655_s20 = smul.f32 %s653_s3, %s653_s3  ;;  %s654_s30 = sadd.f32 %s653_s3, %s650_s6 }
 0x243   : > { %s694_s8 = sld [smem:[#allocation13 + %s1550_s12]] }
 0x244   : > { %s656_s7 = sadd.f32 %s655_s20, %s652_s24 }
 0x245   : > { %s730_s28 = sld [smem:[#allocation7 + %s1694_s11]] }
 0x246   : > { %s1836_s25 = sld [smem:[#allocation7 + %s2054_s19]] }
 0x247   : > { %s1847_s5 = sld [smem:[#allocation7 + %s1721_s2]] }
 0x248   : > { %s2062_s19 = sld [smem:[#allocation48_spill]] }
 0x25d   : > { %s1096_s23 = spop %1095 }
 0x25e   : > { %s602_s10 = smul.f32 0.001953125, %s1096_s23  ;;  %s1856_s23 = sld [smem:[#allocation7 + %s1728_s1]] }
 0x266   : > { %s1098_s0 = spop %1097 }
 0x267   : > { %s626_s26 = smul.f32 0.001953125, %s1098_s0  ;;  %s1100_s16 = spop %1099 }
 0x268   : > { %s665_s15 = smul.f32 %s1100_s16, %s654_s30  ;;  %s2055_s0 = sld [smem:[#allocation37_spill]] }
 0x269   : > { %s675_s17 = smul.f32 %s1100_s16, %s656_s7  ;;  %s2056_s7 = sld [smem:[#allocation38_spill]] }
 0x26a   : > { %s1827_s4 = smul.f32 %s665_s15, %s602_s10  ;;  %s2057_s10 = sld [smem:[#allocation39_spill]] }
 0x26b   : > { %s676_s29 = smul.f32 %s675_s17, %s626_s26  ;;  %s692_s16 = sld [smem:[#allocation12 + %s1550_s12]] }
 0x26c   : > { %s677_s27 = smul.f32 %s1827_s4, %s1827_s4  ;;  %s715_s26 = sld [smem:[#allocation7 + %s1690_s21]] }
 0x26d   : > { %s2060_s30 = sld [smem:[#allocation35_spill]] }
 0x26e   : > { %s678_s22 = ssub.f32 %s676_s29, %s677_s27 }
 0x26f   : > { %s1839_s3 = sld [smem:[#allocation7 + %s2055_s0]] }
 0x270   : > { %s679_s9 = sadd.f32 1e-05, %s678_s22  ;;  %s1088_s22 = sshll.u32 %s1550_s12, 4 }
 0x271   : > { %s1844_s13 = sld [smem:[#allocation7 + %s2056_s7]]  ;;  %s852_s0 = scalar_lea.hbm %s2062_s19, %s1088_s22 }
 0x272   : > { %v680_v2 = vstv %s679_s9 }
 0x273   : > { %1226 = vrsqrt.f32 %v680_v2  ;;  %vm687_vm6 = vweird.f32 %v680_v2 }
 0x279   : > { %v1227_v3 = vpop.eup %1226 }
 0x27a   : > { %v682_v4 = vmul.f32 %v1227_v3, %v680_v2  ;;  %vm688_vm5 = vweird.f32 %v1227_v3 }
 0x27b   : > { %vm689_vm7 = vmor %vm687_vm6, %vm688_vm5 }
 0x27c   : > { %v683_v5 = vmul.f32 %v1227_v3, %v682_v4 }
 0x27e   : > { %v684_v6 = vmul.f32 0.5, %v683_v5 }
 0x280   : > { %v685_v7 = vsub.f32 1.5, %v684_v6 }
 0x282   : > { %v686_v8 = vmul.f32 %v1227_v3, %v685_v7 }
 0x284   : > { %v690_v9 = vsel %vm689_vm7, %v1227_v3, %v686_v8 }
 0x285   : > { %1101 = vpush %v690_v9 }
 0x2b6   : > { %s1102_s14 = spop %1101 }
 0x2b7   : > { %s1841_s18 = smul.f32 %s1102_s14, %s692_s16 }
 0x2b9   : > { %s695_s21 = smul.f32 %s1841_s18, %s1827_s4  ;;  %s2061_s4 = sshll.u32 %s2060_s30, 5 }
 0x2ba   : > { %s697_s6 = smul.f32 %s1841_s18, %s2057_s10  ;;  %s1888_s29 = scalar_lea.vmem [#allocation17], %s2061_s4 }
 0x2bb   : > { %s696_s11 = ssub.f32 %s694_s8, %s695_s21  ;;  %s716_s24 = smul.f32 %s715_s26, %s1841_s18 }
 0x2bc   : > { %v698_v11 = vstv %s697_s6  ;;  %s731_s20 = smul.f32 %s730_s28, %s1841_s18  ;;  %s853_s7 = sshll.u32 %s1888_s29, 4  ;;  %s854_s7 = int_to_ptr.vmem [resolvable:$true] %s853_s7 }
 0x2bd   : > { %v699_v12 = vmul.f32 %v698_v11, %v1760_v30  ;;  %v700_v13 = vmul.f32 %v698_v11, %v1762_v31  ;;  %v1860_v14 = vstv %s696_s11  ;;  %v717_v15 = vstv %s716_s24  ;;  %s746_s2 = smul.f32 %s1836_s25, %s1841_s18  ;;  %s855_s10 = sshll.u32 %s852_s0, 4  ;;  %s856_s10 = int_to_ptr.hbm [resolvable:$true] %s855_s10 }
 0x2be   : > { %v718_v17 = vmul.f32 %v717_v15, %v1760_v30  ;;  %v719_v18 = vmul.f32 %v717_v15, %v1762_v31  ;;  %v732_v19 = vstv %s731_s20  ;;  %s761_s1 = smul.f32 %s1839_s3, %s1841_s18  ;;  %s826_s26 = scalar_lea.sflag [#allocation18], %s2060_s30 }
 0x2bf   : > { %v702_v20 = vadd.f32 %v1860_v14, %v699_v12  ;;  %v703_v21 = vadd.f32 %v1860_v14, %v700_v13  ;;  %v733_v22 = vmul.f32 %v732_v19, %v1760_v30  ;;  %v734_v23 = vmul.f32 %v732_v19, %v1762_v31  ;;  %s776_s15 = smul.f32 %s1844_s13, %s1841_s18  ;;  %s1390_s8 = sshra.s32 %s856_s10, 4  ;;  %s1391_s8 = int_to_ptr.hbm [resolvable:$true] %s1390_s8 }
 0x2c0   : > { %v720_v24 = vadd.f32 %v718_v17, %v1860_v14  ;;  %v721_v25 = vadd.f32 %v719_v18, %v1860_v14  ;;  %v747_v26 = vstv %s746_s2  ;;  %v762_v27 = vstv %s761_s1  ;;  %s791_s17 = smul.f32 %s1847_s5, %s1841_s18  ;;  %s1392_s28 = scalar_lea.hbm %s1391_s8, 32 }
 0x2c1   : > { %v704_v28 = vmax.f32 %v702_v20, 0.0  ;;  %v705_v29 = vmax.f32 %v703_v21, 0.0  ;;  %v735_v32 = vadd.f32 %v733_v22, %v1860_v14  ;;  %v736_v33 = vadd.f32 %v734_v23, %v1860_v14  ;;  %s806_s27 = smul.f32 %s1856_s23, %s1841_s18  ;;  %p1393_p9 = scmp.ne.s32.totalorder %s1391_s8, %s1392_s28 }
 0x2c2   : > { %v722_v34 = vmax.f32 %v720_v24, 0.0  ;;  %v723_v35 = vmax.f32 %v721_v25, 0.0  ;;  %v748_v36 = vmul.f32 %v747_v26, %v1760_v30  ;;  %v749_v37 = vmul.f32 %v747_v26, %v1762_v31  ;;  %s1396_s3 = scalar_lea.hbm %s2062_s19, 96  ;;  %p1397_p13 = scmp.lt.s32.totalorder %s1391_s8, %s2062_s19 }
 0x2c3   : > { %710 = vst.msk [vmem:[%s1888_s29] ss:$8 sm:$0x3] %vm1864_vm8, %v704_v28  ;;  %v737_v38 = vmax.f32 %v735_v32, 0.0  ;;  %v738_v39 = vmax.f32 %v736_v33, 0.0  ;;  %v763_v40 = vmul.f32 %v762_v27, %v1760_v30  ;;  %v764_v41 = vmul.f32 %v762_v27, %v1762_v31  ;;  %p1394_p10 = pnand %p1393_p9, %p1622_p2  ;;  %p1398_p0 = scmp.lt.s32.totalorder %s1396_s3, %s1392_s28 }
 0x2c4   : > { %1063 = vst.msk [vmem:[%s1888_s29 + $0x10] ss:$8 sm:$0x3] %vm1864_vm8, %v705_v29  ;;  %v750_v42 = vadd.f32 %v748_v36, %v1860_v14  ;;  %v751_v43 = vadd.f32 %v749_v37, %v1860_v14  ;;  %v777_v44 = vstv %s776_s15  ;;  %v792_v45 = vstv %s791_s17 }
 0x2c5   : > { %1064 = vst.msk [vmem:[%s1888_s29 + $0x1] ss:$8 sm:$0x3] %vm1864_vm8, %v722_v34  ;;  %v765_v46 = vadd.f32 %v763_v40, %v1860_v14  ;;  %v766_v47 = vadd.f32 %v764_v41, %v1860_v14  ;;  %v778_v48 = vmul.f32 %v777_v44, %v1760_v30  ;;  %v779_v49 = vmul.f32 %v777_v44, %v1762_v31  ;;  %p1395_p12 = pneg %p1394_p10  ;;  %p1399_p1 = por %p1398_p0, %p1397_p13 }
 0x2c6   : > { %1065 = vst.msk [vmem:[%s1888_s29 + $0x11] ss:$8 sm:$0x3] %vm1864_vm8, %v723_v35  ;;  %v752_v50 = vmax.f32 %v750_v42, 0.0  ;;  %v753_v51 = vmax.f32 %v751_v43, 0.0  ;;  %v793_v52 = vmul.f32 %v792_v45, %v1760_v30  ;;  %v794_v53 = vmul.f32 %v792_v45, %v1762_v31 }
 0x2c7   : > { %1066 = vst.msk [vmem:[%s1888_s29 + $0x2] ss:$8 sm:$0x3] %vm1864_vm8, %v737_v38  ;;  %v767_v54 = vmax.f32 %v765_v46, 0.0  ;;  %v780_v55 = vadd.f32 %v778_v48, %v1860_v14  ;;  %v781_v56 = vadd.f32 %v779_v49, %v1860_v14  ;;  %v768_v57 = vmax.f32 %v766_v47, 0.0  ;;  %p1400_p3 = pnand %p1399_p1, %p1395_p12 }
 0x2c8   : > { %1067 = vst.msk [vmem:[%s1888_s29 + $0x12] ss:$8 sm:$0x3] %vm1864_vm8, %v738_v39  ;;  %v795_v58 = vadd.f32 %v793_v52, %v1860_v14  ;;  %v796_v59 = vadd.f32 %v794_v53, %v1860_v14  ;;  %v807_v60 = vstv %s806_s27 }
 0x2c9   : > { %1068 = vst.msk [vmem:[%s1888_s29 + $0x3] ss:$8 sm:$0x3] %vm1864_vm8, %v752_v50  ;;  %v782_v61 = vmax.f32 %v780_v55, 0.0  ;;  %v808_v62 = vmul.f32 %v807_v60, %v1760_v30  ;;  %v809_v63 = vmul.f32 %v807_v60, %v1762_v31  ;;  %v783_v0 = vmax.f32 %v781_v56, 0.0 }
 0x2ca   : > { %1069 = vst.msk [vmem:[%s1888_s29 + $0x13] ss:$8 sm:$0x3] %vm1864_vm8, %v753_v51  ;;  %v797_v1 = vmax.f32 %v795_v58, 0.0  ;;  %v798_v2 = vmax.f32 %v796_v59, 0.0 }
 0x2cb   : > { %1070 = vst.msk [vmem:[%s1888_s29 + $0x4] ss:$8 sm:$0x3] %vm1864_vm8, %v767_v54  ;;  %v810_v30 = vadd.f32 %v808_v62, %v1860_v14  ;;  %v811_v31 = vadd.f32 %v809_v63, %v1860_v14 }
 0x2cc   : > { %1071 = vst.msk [vmem:[%s1888_s29 + $0x14] ss:$8 sm:$0x3] %vm1864_vm8, %v768_v57 }
 0x2cd   : > { %1072 = vst.msk [vmem:[%s1888_s29 + $0x5] ss:$8 sm:$0x3] %vm1864_vm8, %v782_v61  ;;  %v812_v3 = vmax.f32 %v810_v30, 0.0  ;;  %v813_v4 = vmax.f32 %v811_v31, 0.0 }
 0x2ce   : > { %1073 = vst.msk [vmem:[%s1888_s29 + $0x15] ss:$8 sm:$0x3] %vm1864_vm8, %v783_v0 }
 0x2cf   : > { %1074 = vst.msk [vmem:[%s1888_s29 + $0x6] ss:$8 sm:$0x3] %vm1864_vm8, %v797_v1 }
 0x2d0   : > { %1075 = vst.msk [vmem:[%s1888_s29 + $0x16] ss:$8 sm:$0x3] %vm1864_vm8, %v798_v2 }
 0x2d1   : > { %1076 = vst.msk [vmem:[%s1888_s29 + $0x7] ss:$8 sm:$0x3] %vm1864_vm8, %v812_v3 }
 0x2d2   : > { %1077 = vst.msk [vmem:[%s1888_s29 + $0x17] ss:$8 sm:$0x3] %vm1864_vm8, %v813_v4 }
 0x2d3   : > { %1403 = shalt.err (!%p1400_p3)
}
 0x2d4   : > { %s1478_s5 = smov 256   ;;  %s1479_s21 = smov 768  }
 0x2d5   : > { %s1480_s6 = smov 16  }
 0x2d6   : > { %1130 = dma.vmem_to_hbm [thread:$0]  (%p1622_p2), %s854_s7, 512, %s856_s10, %s826_s26, %s1478_s5, %s1479_s21, %s1480_s6  }
 0x2d7 PF: > { %s2064_s11 = sld [smem:[#allocation30_spill]] }
 0x2d8   : > { %s2065_s24 = sld [smem:[#allocation27_spill]] }
 0x2dd   : > { %p1176_p11 = scmp.ge.s32.totalorder %s2064_s11, 2 }
 0x2de   : > { %s870_s23 = sand.u32 1, %s2065_s24  }
 0x2df   : > { %p1157_p5 = pnand %p1176_p11, %p1626_p4  ;;  %s871_s2 = scalar_lea.sflag [#allocation4], %s870_s23 }
 0x2e1   : > { %p1158_p6 = pneg %p1157_p5 }
 0x2e3   : > { %1445 = dma.done.wait (%p1158_p6), %s871_s2, 64  }
 0x2e4   : > { %1447 = vsyncadd (%p1158_p6), %s871_s2, 4294967232  ;;  %s881_s1 = scalar_lea.sflag [#allocation18], %s870_s23 }
 0x2e5   : > { %1449 = dma.done.wait (%p1158_p6), %s881_s1, 512  }
 0x2e6   : > { %1451 = vsyncadd (%p1158_p6), %s881_s1, 4294966784  ;;  %s2067_s30 = sld [smem:[#allocation31_spill]] }
 0x2e7   : > { %s2068_s27 = sld [smem:[#allocation28_spill]] }
 0x2e8   : > { %s2069_s28 = sld [smem:[#allocation29_spill]] }
 0x2e9   : > { %s2070_s29 = sld [smem:[#allocation32_spill]] }
 0x2ec   : > { %p30_p2 = scmp.ge.s32.totalorder %s2067_s30, 5  }
 0x2ee   :  { %32 = sbr.rel (!%p30_p2) target bundleno = 22 (0x16), region = 171 }
 0x2f3   :  { %887 = vsyncpa [#allocation3], 1 }
 0x2f4   :  { %889 = vsyncpa [#allocation3 + $0x1], 1 }
 0x2f5   :  { %890 = vsyncpa [#allocation4], 1 }
 0x2f6   :  { %892 = vsyncpa [#allocation4 + $0x1], 1 }
 0x2f7   :  { %893 = vsyncpa [#allocation18], 1 }
 0x2f8   :  { %895 = vsyncpa [#allocation18 + $0x1], 1 }
 0x2f9   :  { %896 = vsyncpa [#allocation5], 1 }
 0x2fa   :  { %898 = vsyncpa [#allocation5 + $0x1], 1 }
 0x2fb   :  { %899 = vsyncpa [#allocation8], 1 }
 0x2fc   :  { %900 = vsyncpa [#allocation6], 1 }
 0x2fd   :  { %902 = vsyncpa [#allocation6 + $0x1], 1 }
 0x2fe   :  { %903 = vsyncpa [#allocation11], 1 }
 0x2ff   :  { %904 = vsyncpa [#allocation14], 1 }

</bundles_post_ra>
